<compile_context>
chip_gen: v6e
topology: v6e:2x2x1
jax: 0.10.0
libtpu: 0.0.40
codegen_flags: <defaults>
</compile_context>

<pallas_src>
import math
from functools import partial

import jax
import jax.numpy as jnp
from jax import lax
from jax.experimental import pallas as pl
from jax.experimental.pallas import tpu as pltpu


_LANES = 128


def _round_up(x, m):
    return (x + m - 1) // m * m


def _vmem():
    return pl.BlockSpec(memory_space=pltpu.MemorySpace.VMEM)


# ---------------------------------------------------------------------------
# Shared backbone: bf16 MXU matmuls, f32 accumulation.  The ones column used
# for the bias term of the ridge regression is folded into b2 (column `embed`
# of b2p is 1.0, the matching w2p column is 0), so z already equals [phi(x), 1]
# on the real columns and 0 on the padded columns.
# ---------------------------------------------------------------------------

def _embed(x_bf, w1_bf, b1_f32, w2_bf, b2_f32):
    h = jnp.dot(x_bf, w1_bf, preferred_element_type=jnp.float32) + b1_f32
    h = jnp.maximum(h, 0.0)
    z = jnp.dot(h.astype(jnp.bfloat16), w2_bf,
                preferred_element_type=jnp.float32) + b2_f32
    return z                                            # (m, dp) float32


# ---------------------------------------------------------------------------
# Woodbury branch kernel (n_support <= output_dim + 1):
#   emits M = [x_sup ; zq_aug] @ x_sup^T in one dot:
#     M[:ns, :ns] = G = x_sup x_sup^T     (lambda*I added in JAX)
#     M[ns:, :ns] = scores = zq_aug x_sup^T
# ---------------------------------------------------------------------------

def _woodbury_kernel(x_ref, w1_ref, b1_ref, w2_ref, b2_ref, m_ref,
                     *, ns, inv_sqrt):
    z = _embed(x_ref[...], w1_ref[...], b1_ref[...], w2_ref[...], b2_ref[...])
    rows = lax.broadcasted_iota(jnp.int32, (z.shape[0], 1), 0)
    is_sup = rows < ns
    z_lhs = z * jnp.where(is_sup, inv_sqrt, 1.0)        # [x_sup ; zq_aug]
    z_sup = z * jnp.where(is_sup, inv_sqrt, 0.0)        # x_sup, query rows zeroed
    # contract the (padded, lane-dense) feature axis -> no explicit transpose;
    # columns >= ns are exactly zero and sliced off in the wrapper
    m_ref[...] = lax.dot_general(z_lhs, z_sup, (((1,), (1,)), ((), ())),
                                 preferred_element_type=jnp.float32)


# ---------------------------------------------------------------------------
# Standard branch kernel (n_support > output_dim + 1):
#   emits G = x_sup^T x_sup, X^T Y, and the raw embeddings z (query rows are
#   sliced out in the wrapper for the head matmul).
# ---------------------------------------------------------------------------

def _standard_kernel(x_ref, w1_ref, b1_ref, w2_ref, b2_ref, y_ref,
                     g_ref, xty_ref, z_ref, *, ns, inv_sqrt):
    z = _embed(x_ref[...], w1_ref[...], b1_ref[...], w2_ref[...], b2_ref[...])
    rows = lax.broadcasted_iota(jnp.int32, (z.shape[0], 1), 0)
    x_sup = z * jnp.where(rows < ns, inv_sqrt, 0.0)     # (m, dp), query rows zero
    g_ref[...] = lax.dot_general(x_sup, x_sup, (((0,), (0,)), ((), ())),
                                 preferred_element_type=jnp.float32)
    xty_ref[...] = lax.dot_general(x_sup, y_ref[...], (((0,), (0,)), ((), ())),
                                   preferred_element_type=jnp.float32)
    z_ref[...] = z


# ---------------------------------------------------------------------------
# RRNet forward (call under jax.jit)
# ---------------------------------------------------------------------------

def rrnet_forward(train_imgs, train_labels, query_imgs, backbone_params,
                  lam, adj_scale, adj_bias):
    w1, b1, w2, b2 = backbone_params
    ns, n_way = train_labels.shape                      # ns = n_way * n_shot
    nq = query_imgs.shape[0]
    m = ns + nq
    d_in, hidden = w1.shape
    embed = w2.shape[1]
    d_aug = embed + 1
    dp = _round_up(d_aug, _LANES)                       # padded feature width
    hp = _round_up(hidden, _LANES)                      # padded hidden width
    inv_sqrt = 1.0 / math.sqrt(ns)                      # static, folded in

    # flatten NCHW and batch support + query through one backbone pass (bf16)
    xs = train_imgs.reshape(ns, -1)
    xq = query_imgs.reshape(nq, -1)
    x_all = jnp.concatenate([xs, xq], axis=0).astype(jnp.bfloat16)   # (m, d_in)

    # zero-pad hidden / feature widths to lane-dense sizes; fold the ones
    # column into the bias (w2p column `embed` stays zero => exact 1.0).
    w1p = jnp.zeros((d_in, hp), jnp.bfloat16).at[:, :hidden].set(
        w1.astype(jnp.bfloat16))
    b1p = jnp.zeros((1, hp), jnp.float32).at[:, :hidden].set(
        b1.reshape(1, -1).astype(jnp.float32))
    w2p = jnp.zeros((hp, dp), jnp.bfloat16).at[:hidden, :embed].set(
        w2.astype(jnp.bfloat16))
    b2p = (jnp.zeros((1, dp), jnp.float32)
           .at[:, :embed].set(b2.reshape(1, -1).astype(jnp.float32))
           .at[0, embed].set(1.0))

    lam = jnp.asarray(lam, jnp.float32)
    adj_scale = jnp.asarray(adj_scale, jnp.float32)
    adj_bias = jnp.asarray(adj_bias, jnp.float32)
    y_scaled = train_labels.astype(jnp.float32) * inv_sqrt          # (ns, n_way)

    backbone_flops = 2 * m * (d_in * hp + hp * dp)
    backbone_bytes = (2 * (x_all.size + w1p.size + w2p.size)
                      + 4 * (b1p.size + b2p.size))

    if ns > d_aug:
        # ---- standard ridge regression: wb = inv(X^T X + lam I) X^T Y ----
        nwp = _round_up(n_way, _LANES)
        y_pad = jnp.zeros((m, nwp), jnp.float32).at[:ns, :n_way].set(y_scaled)
        cost = pl.CostEstimate(
            flops=backbone_flops + 2 * m * dp * (dp + nwp),
            transcendentals=0,
            bytes_accessed=backbone_bytes
            + 4 * (m * nwp + dp * dp + dp * nwp + m * dp))
        g, xty, z_all = pl.pallas_call(
            partial(_standard_kernel, ns=ns, inv_sqrt=inv_sqrt),
            out_shape=(jax.ShapeDtypeStruct((dp, dp), jnp.float32),
                       jax.ShapeDtypeStruct((dp, nwp), jnp.float32),
                       jax.ShapeDtypeStruct((m, dp), jnp.float32)),
            in_specs=[_vmem()] * 6,
            out_specs=(_vmem(), _vmem(), _vmem()),
            cost_estimate=cost,
        )(x_all, w1p, b1p, w2p, b2p, y_pad)

        # TODO(synk): torch.inverse of the tiny (d_aug, d_aug) normal matrix has
        # no clean Pallas equivalent; solved in plain JAX (also numerically nicer).
        g_s = g[:d_aug, :d_aug] + lam * jnp.eye(d_aug, dtype=jnp.float32)
        wb = jnp.linalg.solve(g_s, xty[:d_aug, :n_way])              # (d_aug, n_way)
        out = z_all[ns:, :d_aug] @ wb                                # (nq, n_way)
    else:
        # ---- woodbury: wb = X^T inv(X X^T + lam I) Y, reassociated so the
        #      kernel emits [G ; scores] and the solve/head stay in XLA ----
        cost = pl.CostEstimate(
            flops=backbone_flops + 2 * m * m * dp,
            transcendentals=0,
            bytes_accessed=backbone_bytes + 4 * m * m)
        gm = pl.pallas_call(
            partial(_woodbury_kernel, ns=ns, inv_sqrt=inv_sqrt),
            out_shape=jax.ShapeDtypeStruct((m, m), jnp.float32),
            in_specs=[_vmem()] * 5,
            out_specs=_vmem(),
            cost_estimate=cost,
        )(x_all, w1p, b1p, w2p, b2p)

        # TODO(synk): tiny (ns, ns) inverse/solve kept in plain JAX.
        g = gm[:ns, :ns] + lam * jnp.eye(ns, dtype=jnp.float32)
        sol = jnp.linalg.solve(g, y_scaled)                          # (ns, n_way)
        out = gm[ns:, :ns] @ sol                                     # (nq, n_way)

    # AdjustLayer (base == 1)
    return out * adj_scale + adj_bias


# ---------------------------------------------------------------------------
# Deterministic setup + run
# ---------------------------------------------------------------------------

if __name__ == "__main__":
    key = jax.random.PRNGKey(0)
    k1, k2, k3, k4, k5 = jax.random.split(key, 5)

    # small, forward-consistent shapes
    C, H, W = 4, 16, 16
    n_way, n_shot, n_query_per_class = 5, 2, 3
    n_support = n_way * n_shot                  # 10
    n_query = n_way * n_query_per_class         # 15
    d_in, hidden, embed = C * H * W, 64, 32

    # deterministic backbone parameters
    w1 = jax.random.normal(k1, (d_in, hidden), jnp.float32) / math.sqrt(d_in)
    b1 = jnp.zeros((1, hidden), jnp.float32)
    w2 = jax.random.normal(k2, (hidden, embed), jnp.float32) / math.sqrt(hidden)
    b2 = jnp.zeros((1, embed), jnp.float32)
    backbone_params = (w1, b1, w2, b2)

    train_imgs = jax.random.normal(k3, (n_support, C, H, W), jnp.float32)
    query_imgs = jax.random.normal(k4, (n_query, C, H, W), jnp.float32)
    # one-hot labels, (n_support, n_way): shot-major repetition of eye(n_way)
    train_labels = jnp.tile(jnp.eye(n_way, dtype=jnp.float32), (n_shot, 1))

    fwd = jax.jit(rrnet_forward)
    lam = jnp.float32(1.0)          # LambdaLayer.l   (base = 1)
    adj_scale = jnp.float32(1e-4)   # AdjustLayer.scale (base = 1)
    adj_bias = jnp.float32(0.0)     # AdjustLayer.bias

    # woodbury branch (n_support <= output_dim + 1)
    y_hat = fwd(train_imgs, train_labels, query_imgs, backbone_params,
                lam, adj_scale, adj_bias)
    y_hat = jax.block_until_ready(y_hat)
    assert y_hat.shape == (n_query, n_way)
    assert jnp.all(jnp.isfinite(y_hat))

    # standard branch (n_support > output_dim + 1): shrink the embedding dim
    embed2 = 8
    w2s = jax.random.normal(k5, (hidden, embed2), jnp.float32) / math.sqrt(hidden)
    b2s = jnp.zeros((1, embed2), jnp.float32)
    y_hat2 = fwd(train_imgs, train_labels, query_imgs, (w1, b1, w2s, b2s),
                 lam, adj_scale, adj_bias)
    y_hat2 = jax.block_until_ready(y_hat2)
    assert y_hat2.shape == (n_query, n_way)
    assert jnp.all(jnp.isfinite(y_hat2))

    print("KERNEL_OK")
</pallas_src>

<mosaic_0001>
module attributes {stable_mosaic.version = 11 : i64} {
  func.func @_woodbury_kernel(%arg0: memref<25x1024xbf16, #tpu.memory_space<vmem>>, %arg1: memref<1024x128xbf16, #tpu.memory_space<vmem>>, %arg2: memref<1x128xf32, #tpu.memory_space<vmem>>, %arg3: memref<128x128xbf16, #tpu.memory_space<vmem>>, %arg4: memref<1x128xf32, #tpu.memory_space<vmem>>, %arg5: memref<25x25xf32, #tpu.memory_space<vmem>>) attributes {dimension_semantics = [], scalar_prefetch = 0 : i64, scratch_operands = 0 : i64, tpu.core_type = #tpu.core_type<tc>} {
    %c0 = arith.constant 0 : index
    %c0_0 = arith.constant 0 : index
    %0 = vector.load %arg0[%c0, %c0_0] : memref<25x1024xbf16, #tpu.memory_space<vmem>>, vector<25x1024xbf16>
    %c0_1 = arith.constant 0 : index
    %c0_2 = arith.constant 0 : index
    %1 = vector.load %arg1[%c0_1, %c0_2] : memref<1024x128xbf16, #tpu.memory_space<vmem>>, vector<1024x128xbf16>
    %c0_3 = arith.constant 0 : index
    %c0_4 = arith.constant 0 : index
    %2 = vector.load %arg2[%c0_3, %c0_4] : memref<1x128xf32, #tpu.memory_space<vmem>>, vector<1x128xf32>
    %c0_5 = arith.constant 0 : index
    %c0_6 = arith.constant 0 : index
    %3 = vector.load %arg3[%c0_5, %c0_6] : memref<128x128xbf16, #tpu.memory_space<vmem>>, vector<128x128xbf16>
    %c0_7 = arith.constant 0 : index
    %c0_8 = arith.constant 0 : index
    %4 = vector.load %arg4[%c0_7, %c0_8] : memref<1x128xf32, #tpu.memory_space<vmem>>, vector<1x128xf32>
    %cst = arith.constant dense<0.000000e+00> : vector<25x128xf32>
    %5 = tpu.matmul %0, %1, %cst {dimension_numbers = #tpu.dot_dimension_numbers<[1], [0], [0], [1], [0, 0, 1, 1], [], []>} : vector<25x1024xbf16>, vector<1024x128xbf16>, vector<25x128xf32> -> vector<25x128xf32>
    %6 = vector.broadcast %2 : vector<1x128xf32> to vector<25x128xf32>
    %7 = arith.addf %5, %6 : vector<25x128xf32>
    %cst_9 = arith.constant 0.000000e+00 : f32
    %8 = vector.broadcast %cst_9 : f32 to vector<25x128xf32>
    %9 = arith.maximumf %7, %8 : vector<25x128xf32>
    %10 = arith.truncf %9 : vector<25x128xf32> to vector<25x128xbf16>
    %cst_10 = arith.constant dense<0.000000e+00> : vector<25x128xf32>
    %11 = tpu.matmul %10, %3, %cst_10 {dimension_numbers = #tpu.dot_dimension_numbers<[1], [0], [0], [1], [0, 0, 1, 1], [], []>} : vector<25x128xbf16>, vector<128x128xbf16>, vector<25x128xf32> -> vector<25x128xf32>
    %12 = vector.broadcast %4 : vector<1x128xf32> to vector<25x128xf32>
    %13 = arith.addf %11, %12 : vector<25x128xf32>
    %14 = tpu.iota {dimensions = array<i32: 0>} : vector<25x1xi32>
    %c10_i32 = arith.constant 10 : i32
    %15 = vector.broadcast %c10_i32 : i32 to vector<25x1xi32>
    %16 = arith.cmpi slt, %14, %15 : vector<25x1xi32>
    %cst_11 = arith.constant 0.316227764 : f32
    %cst_12 = arith.constant 1.000000e+00 : f32
    %17 = vector.broadcast %cst_11 : f32 to vector<25x1xf32>
    %18 = vector.broadcast %cst_12 : f32 to vector<25x1xf32>
    %19 = arith.select %16, %17, %18 : vector<25x1xi1>, vector<25x1xf32>
    %20 = vector.broadcast %19 : vector<25x1xf32> to vector<25x128xf32>
    %21 = arith.mulf %13, %20 : vector<25x128xf32>
    %cst_13 = arith.constant 0.316227764 : f32
    %cst_14 = arith.constant 0.000000e+00 : f32
    %22 = vector.broadcast %cst_13 : f32 to vector<25x1xf32>
    %23 = vector.broadcast %cst_14 : f32 to vector<25x1xf32>
    %24 = arith.select %16, %22, %23 : vector<25x1xi1>, vector<25x1xf32>
    %25 = vector.broadcast %24 : vector<25x1xf32> to vector<25x128xf32>
    %26 = arith.mulf %13, %25 : vector<25x128xf32>
    %cst_15 = arith.constant dense<0.000000e+00> : vector<25x25xf32>
    %27 = tpu.matmul %21, %26, %cst_15 {dimension_numbers = #tpu.dot_dimension_numbers<[1], [1], [0], [0], [0, 0, 1, 0], [], []>} : vector<25x128xf32>, vector<25x128xf32>, vector<25x25xf32> -> vector<25x25xf32>
    %c0_16 = arith.constant 0 : index
    %c0_17 = arith.constant 0 : index
    %28 = vector.load %arg5[%c0_16, %c0_17] : memref<25x25xf32, #tpu.memory_space<vmem>>, vector<25x25xf32>
    tpu.vector_store %arg5[%c0_16, %c0_17], %27 {strides = array<i32>} : memref<25x25xf32, #tpu.memory_space<vmem>>, vector<25x25xf32>,
    return
  }
}

</mosaic_0001>

<bundles_post_ra>
// kernel: custom-call.8
= control target key start
LH: loop header
LB: loop body
LE: loop exit
PB: predicated region body
PF: predicated region fallthrough
CT: control target
= control target key end

     0   :  { %5 = vsyncpa [#allocation4], 0  ;;  %s874_s0 = inlined_call_operand.vmem [shape: f32[10,10], index: 0, kind: input, shape index: {}]   ;;  %s875_s1 = inlined_call_operand.vmem [shape: f32[10,10], index: 1, kind: output, shape index: {0}]   ;;  %s876_s2 = inlined_call_operand.hbm [shape: s32[10], index: 2, kind: output, shape index: {1}]   ;;  %s877_s3 = inlined_call_operand.vmem [shape: s32[10], index: 3, kind: output, shape index: {2}]  }
   0x1   :  { %s19_s14 = scalar_lea.vmem %s874_s0, 8 }
   0x2   :  { %p461_p0 = scmp.gt.s32.totalorder %s874_s0, %s19_s14 }
   0x3   :  { %s752_s17 = smov (!%p461_p0), [#allocation0]   ;;  %s756_s20 = smov (!%p461_p0), %s874_s0  }
   0x4   :  { %462 = sbr.rel (%p461_p0) target bundleno = 17 (0x11), region = 157 }
   0x9 LB: > { %v53_v0 = vld [vmem:[%s758_s20] sm:$0xff]  ;;  %s55_s20 = scalar_lea.vmem %s758_s20, 8   ;;  %s758_s20 = sphi %s756_s20, %s55_s20   ;;  %s754_s17 = sphi %s752_s17, %s56_s17  }
   0xa   : > { %54 = vst [vmem:[%s754_s17] sm:$0xff] %v53_v0  ;;  %s56_s17 = scalar_lea.vmem %s754_s17, 8   ;;  %p50_p1 = scmp.gt.s32.totalorder %s55_s20, %s19_s14 }
   0xc   :  { %52 = sbr.rel (!%p50_p1) target bundleno = 9 (0x9), region = 163 }
  0x11 PF:  { %v69_v1 = vld [vmem:[#allocation0] sm:$0xff]  ;;  %v73_v2 = vld [vmem:[#allocation0 + $0x8] sm:$0xff]  ;;  %v76_v3 = vlaneseq  ;;  %v776_v4 = vmov 0   ;;  %s760_s0 = smov 0  }
  0x12   :  { %70 = vst [vmem:[#allocation1] sm:$0xff] %v69_v1  ;;  %74 = vst [vmem:[#allocation1 + $0x8] sm:$0xff] %v73_v2 }
  0x13   :  { %75 = vst [vmem:[#allocation2] sm:$0x1] %v776_v4  ;;  %v808_v5 = vshrl.u32 %v76_v3, 7 }
  0x14 LB: > { %s519_s21 = sshll.u32 %s762_s0, 3  ;;  %s84_s0 = sadd.s32 1, %s762_s0   ;;  %s762_s0 = sphi %s760_s0, %s84_s0  }
  0x15   : > { %v88_v6 = vstv %s519_s21  ;;  %s86_s22 = scalar_lea.vmem [#allocation7], %s519_s21  ;;  %p81_p2 = scmp.ge.s32.totalorder %s84_s0, 2  }
  0x16   : > { %v89_v7 = vadd.s32 %v88_v6, %v808_v5  ;;  %s811_s23 = smov (%p81_p2), 0  }
  0x17   :  { %83 = sbr.rel (!%p81_p2) target bundleno = 20 (0x14), region = 174 }
  0x18   : > { %90 = vst [vmem:[%s86_s22] sm:$0xff] %v89_v7 }
  0x1c LB: > { %v101_v8 = vld [vmem:[#allocation1] sm:$0xff]  ;;  %v113_v9 = vld [vmem:[#allocation1 + $0x8] sm:$0xff]  ;;  %v817_v10 = vadd.s32 8, %v808_v5  ;;  %v820_v12 = vstv %s766_s23  ;;  %s159_s24 = ssub.s32 128, %s766_s23  ;;  %v165_v45 = vand.u32 127, %v76_v3  ;;  %s171_s25 = scalar_lea.vmem [#allocation1], %s766_s23  ;;  %s766_s23 = sphi %s811_s23, %s96_s23  }
  0x1d   : > { %v102_v11 = vand.u32 2147483647, %v101_v8  ;;  %v114_v13 = vand.u32 2147483647, %v113_v9  ;;  %vm105_vm1 = vcmp.ge.s32.totalorder %v808_v5, %v820_v12  ;;  %v168_v48 = vld [vmem:[#allocation2] ss:$0 sm:$0xff] }
  0x1e   : > { %vm118_vm0 = vcmp.lt.s32.totalorder %v817_v10, 10  ;;  %vm117_vm3 = vcmp.ge.s32.totalorder %v817_v10, %v820_v12  ;;  %vm189_vm15 = vcmp.gt.s32.totalorder %v165_v45, %v820_v12  ;;  %v173_v49 = vld [vmem:[%s171_s25] ss:$0 sm:$0xff]  ;;  %s177_s27 = scalar_lea.vmem [#allocation7], %s766_s23  ;;  %s96_s23 = sadd.s32 1, %s766_s23  }
  0x1f   : > { %vm521_vm2 = vcmp.gt.f32.partialorder %v102_v11, -inf  ;;  %vm119_vm5 = vmand %vm117_vm3, %vm118_vm0  ;;  %vm212_vm0 = vcmp.gt.s32.totalorder %v817_v10, %v820_v12  ;;  %v179_v50 = vld [vmem:[%s177_s27] ss:$0 sm:$0xff]  ;;  %p93_p3 = scmp.ge.s32.totalorder %s96_s23, 10  }
  0x20   : > { %vm109_vm4 = vmand %vm105_vm1, %vm521_vm2  ;;  %vm166_vm1 = vcmp.eq.s32.totalorder %v165_v45, %v820_v12  ;;  %s768_s5 = smov (%p93_p3), %s875_s1   ;;  %s772_s6 = smov (%p93_p3), [#allocation1]  }
  0x21   : > { %v110_v14 = vsel %vm109_vm4, %v808_v5, %v820_v12  ;;  %v111_v15 = vsel %vm109_vm4, %v102_v11, -inf  ;;  %vm841_vm2 = vmand %vm212_vm0, %vm166_vm1  ;;  %vm197_vm4 = vcmp.gt.s32.totalorder %v808_v5, %v820_v12 }
  0x22   : > { %vm120_vm6 = vcmp.lt.f32.partialorder %v111_v15, %v114_v13 }
  0x23   : > { %vm121_vm7 = vmand %vm119_vm5, %vm120_vm6 }
  0x24   : > { %v122_v16 = vsel %vm121_vm7, %v817_v10, %v110_v14  ;;  %v123_v17 = vsel %vm121_vm7, %v114_v13, %v111_v15  ;;  %vm201_vm6 = vmand %vm197_vm4, %vm166_vm1 }
  0x25   : > { %v124_v18 = vrot.slane %v123_v17, 1  ;;  %v125_v19 = vrot.slane %v122_v16, 1 }
  0x27   : > { %vm126_vm8 = vcmp.ge.f32.partialorder %v124_v18, %v123_v17  ;;  %v129_v20 = vrot.slane %v124_v18, 1  ;;  %v130_v21 = vrot.slane %v125_v19, 1 }
  0x28   : > { %v127_v22 = vsel %vm126_vm8, %v124_v18, %v123_v17  ;;  %v128_v23 = vsel %vm126_vm8, %v125_v19, %v122_v16 }
  0x29   : > { %vm131_vm9 = vcmp.ge.f32.partialorder %v129_v20, %v127_v22  ;;  %v134_v24 = vrot.slane %v129_v20, 1  ;;  %v135_v25 = vrot.slane %v130_v21, 1 }
  0x2a   : > { %v132_v26 = vsel %vm131_vm9, %v129_v20, %v127_v22  ;;  %v133_v27 = vsel %vm131_vm9, %v130_v21, %v128_v23 }
  0x2b   : > { %vm136_vm10 = vcmp.ge.f32.partialorder %v134_v24, %v132_v26  ;;  %v139_v28 = vrot.slane %v134_v24, 1  ;;  %v140_v29 = vrot.slane %v135_v25, 1 }
  0x2c   : > { %v137_v30 = vsel %vm136_vm10, %v134_v24, %v132_v26  ;;  %v138_v31 = vsel %vm136_vm10, %v135_v25, %v133_v27 }
  0x2d   : > { %vm141_vm11 = vcmp.ge.f32.partialorder %v139_v28, %v137_v30  ;;  %v144_v32 = vrot.slane %v139_v28, 1  ;;  %v145_v33 = vrot.slane %v140_v29, 1 }
  0x2e   : > { %v142_v34 = vsel %vm141_vm11, %v139_v28, %v137_v30  ;;  %v143_v35 = vsel %vm141_vm11, %v140_v29, %v138_v31 }
  0x2f   : > { %vm146_vm12 = vcmp.ge.f32.partialorder %v144_v32, %v142_v34  ;;  %v149_v36 = vrot.slane %v144_v32, 1  ;;  %v150_v37 = vrot.slane %v145_v33, 1 }
  0x30   : > { %v147_v38 = vsel %vm146_vm12, %v144_v32, %v142_v34  ;;  %v148_v39 = vsel %vm146_vm12, %v145_v33, %v143_v35 }
  0x31   : > { %vm151_vm13 = vcmp.ge.f32.partialorder %v149_v36, %v147_v38  ;;  %v154_v40 = vrot.slane %v149_v36, 1  ;;  %v155_v41 = vrot.slane %v150_v37, 1 }
  0x32   : > { %v152_v42 = vsel %vm151_vm13, %v149_v36, %v147_v38  ;;  %v153_v43 = vsel %vm151_vm13, %v150_v37, %v148_v39 }
  0x33   : > { %vm156_vm14 = vcmp.ge.f32.partialorder %v154_v40, %v152_v42 }
  0x34   : > { %v158_v44 = vsel %vm156_vm14, %v155_v41, %v153_v43 }
  0x35   : > { %160 = vrot.lane.b32.xlu0 %v158_v44, %s159_s24 }
  0xa7   : > { %v161_v47 = vpop.permute.xlu0 %160 }
  0xa8   : > { %529 = vpush %v161_v47 }
  0xd9   : > { %s530_s26 = spop %529 }
  0xda   : > { %v167_v51 = vstv %s530_s26  ;;  %s172_s28 = scalar_lea.vmem [#allocation1], %s530_s26  ;;  %s178_s29 = scalar_lea.vmem [#allocation7], %s530_s26 }
  0xdb   : > { %v169_v52 = vsel %vm166_vm1, %v167_v51, %v168_v48  ;;  %v174_v53 = vld [vmem:[%s172_s28] ss:$0 sm:$0xff] }
  0xdc   : > { %v180_v54 = vld [vmem:[%s178_s29] ss:$0 sm:$0xff]  ;;  %170 = vst [vmem:[#allocation2] sm:$0x1] %v169_v52  ;;  %175 = vst [vmem:[%s172_s28] sm:$0x1] %v173_v49  ;;  %vm183_vm3 = vcmp.ne.f32.partialorder %v174_v53, 0.0 }
  0xdd   : > { %181 = vst [vmem:[%s178_s29] sm:$0x1] %v179_v50  ;;  %176 = vst [vmem:[%s171_s25] sm:$0x1] %v174_v53  ;;  %v190_v2 = vsel %vm189_vm15, %v174_v53, 0.0 }
  0xde   : > { %182 = vst [vmem:[%s177_s27] sm:$0x1] %v180_v54  ;;  %vm184_vm5 = vmand %vm166_vm1, %vm183_vm3 }
  0xdf   : > { %v185_v55 = vsel %vm184_vm5, %v174_v53, 1.0 }
  0xe0   : > { %v213_v56 = vsel %vm212_vm0, %v185_v55, 1.0  ;;  %v198_v57 = vsel %vm197_vm4, %v185_v55, 1.0 }
  0xe1   : > { %662 = vrcp.f32 %v213_v56 }
  0xe2   : > { %664 = vrcp.f32 %v198_v57 }
  0xe3   :  { %v277_v12 = vld [vmem:[#allocation2] sm:$0x1] (%p93_p3) }
  0xe4   : > { %v209_v59 = vld [vmem:[#allocation1 + $0x8] sm:$0xff]  ;;  %v194_v62 = vld [vmem:[#allocation1] sm:$0xff]  ;;  %280 = vst [vmem:[#allocation3] sm:$0x1] (%p93_p3), %v277_v12 }
  0xe5   :  { %v223_v11 = vld [vmem:[#allocation7] sm:$0xff] (%p93_p3)  ;;  %v225_v13 = vld [vmem:[#allocation7 + $0x8] sm:$0xff] (%p93_p3) }
  0xee   : > { %v663_v58 = vpop.eup %662 }
  0xef   : > { %v665_v60 = vpop.eup %664  ;;  %v215_v61 = vmul.f32 %v663_v58, %v209_v59 }
  0xf0   : > { %v200_v63 = vmul.f32 %v665_v60, %v194_v62 }
  0xf1   : > { %v217_v0 = vsel %vm841_vm2, %v215_v61, 0.0 }
  0xf2   : > { %218 = vadd.xlane.f32.xlu1 %v217_v0  ;;  %v202_v1 = vsel %vm201_vm6, %v200_v63, 0.0 }
  0xf3   : > { %203 = vadd.xlane.f32.xlu0 %v202_v1 }
 0x120   :  { %240 = vxpose.xlu0.b32.start [1/2] (short) (narrow) (%p93_p3), %v223_v11, 8 }
 0x124   :  { %241 = vxpose.xlu0.b32.end [2/2] (short) (narrow) (%p93_p3), %v225_v13, 8 }
 0x17b   : > { %v219_v4 = vpop.xlane.xlu1 %218 }
 0x17c   : > { %v220_v6 = vmul.f32 %v219_v4, %v190_v2  ;;  %v204_v7 = vpop.xlane.xlu0 %203 }
 0x17d   : > { %v205_v8 = vmul.f32 %v204_v7, %v190_v2  ;;  %95 = sbr.rel (!%p93_p3) target bundleno = 28 (0x1c), region = 185 }
 0x17e   : > { %v221_v9 = vsub.f32 %v215_v61, %v220_v6 }
 0x17f   : > { %v206_v10 = vsub.f32 %v200_v63, %v205_v8 }
 0x180   : > { %222 = vst [vmem:[#allocation1 + $0x8] sm:$0xff] %v221_v9 }
 0x181   : > { %207 = vst [vmem:[#allocation1] sm:$0xff] %v206_v10 }
 0x19c   :  { %v256_v14 = vpop.trf.xlu0 }
 0x19d   :  { %272 = vst [vmem:[#allocation5] sm:$0x1] %v256_v14 }
 0x1a4   :  { %v285_v15 = vld [vmem:[#allocation5] sm:$0x1] }
 0x1a5   :  { %288 = vst [vmem:[#allocation6] sm:$0x1] %v285_v15 }
 0x1a6 LB: > { %v336_v16 = vld [vmem:[%s774_s6] sm:$0xff]  ;;  %s338_s6 = scalar_lea.vmem %s774_s6, 8   ;;  %s774_s6 = sphi %s772_s6, %s338_s6   ;;  %s770_s5 = sphi %s768_s5, %s339_s5  }
 0x1a7   : > { %337 = vst [vmem:[%s770_s5] sm:$0xff] %v336_v16  ;;  %s339_s5 = scalar_lea.vmem %s770_s5, 8   ;;  %p333_p4 = scmp.gt.s32.totalorder %s338_s6, [#allocation1 + $0x8] }
 0x1a8   :  { %s777_s7 = smov (%p333_p4), [#allocation3]  }
 0x1a9   :  { %335 = sbr.rel (!%p333_p4) target bundleno = 422 (0x1a6), region = 207  ;;  %s357_s8 = sshll.u32 (%p333_p4), %s777_s7, 4  ;;  %s358_s8 = int_to_ptr.vmem [resolvable:$true] %s357_s8 }
 0x1aa   :  { %s666_s1 = scalar_lea.vmem (%p333_p4), %s358_s8, 16  ;;  %s670_s11 = scalar_lea.vmem (%p333_p4), %s358_s8, 32 }
 0x1ab   :  { %p667_p5 = scmp.ne.s32.totalorder (%p333_p4), %s358_s8, %s666_s1  ;;  %p671_p6 = scmp.lt.s32.totalorder (%p333_p4), %s358_s8, %s358_s8 }
 0x1ac   :  { %v424_v3 = vld [vmem:[#allocation6] sm:$0x1] (%p333_p4)  ;;  %p672_p7 = scmp.lt.s32.totalorder (%p333_p4), %s670_s11, %s666_s1 }
 0x1ad   :  { %425 = vst [vmem:[%s877_s3] sm:$0x1] (%p333_p4), %v424_v3 }
 0x1ae   :  { %p673_p8 = por %p672_p7, %p671_p6 }
 0x1b0   :  { %p674_p9 = pnand %p673_p8, %p667_p5 }
 0x1b2   :  { %677 = shalt.err (!%p674_p9)
}
 0x1b3   :  { %360 = dma.vmem_to_hbm [thread:$0]  %s358_s8, 16, %s876_s2, [#allocation4]  }
 0x1b4   :  { %750 = dma.done.wait [#allocation4], 16  }
 0x1b5   :  { %751 = vsyncadd [#allocation4], 4294967280 }
 0x1b6   :  { %431 = vsyncpa [#allocation4], 1 }

// kernel: custom-call.10
= control target key start
LH: loop header
LB: loop body
LE: loop exit
PB: predicated region body
PF: predicated region fallthrough
CT: control target
= control target key end

     0   :  { %v39_v0 = vlaneseq  ;;  %v250_v9 = vmov -1.0   ;;  %v251_v53 = vmov 0.0   ;;  %s305_s0 = inlined_call_operand.vmem [shape: f32[1,10,10], index: 0, kind: input, shape index: {}]   ;;  %s306_s1 = inlined_call_operand.vmem [shape: f32[1,10,10], index: 1, kind: output, shape index: {}]  }
   0x1   :  { %v32_v1 = vld [vmem:[%s305_s0] sm:$0xff]  ;;  %v34_v36 = vld [vmem:[%s305_s0 + $0x8] sm:$0xff] }
   0x2   :  { %v265_v2 = vand.u32 127, %v39_v0  ;;  %v43_v3 = vshrl.u32 %v39_v0, 7 }
   0x4   :  { %vm45_vm0 = vcmp.eq.s32.totalorder %v43_v3, %v265_v2  ;;  %vm41_vm1 = vcmp.lt.s32.totalorder %v265_v2, 10  ;;  %vm50_vm2 = vcmp.ge.s32.totalorder %v43_v3, %v265_v2  ;;  %vm80_vm4 = vcmp.eq.s32.totalorder %v265_v2, 0 }
   0x5   :  { %v47_v4 = vsel %vm45_vm0, %v32_v1, 0.0  ;;  %vm51_vm3 = vmand %vm50_vm2, %vm41_vm1  ;;  %vm77_vm5 = vcmp.eq.s32.totalorder %v265_v2, %v43_v3  ;;  %v81_v10 = vsel %vm80_vm4, 1.0, %v250_v9  ;;  %vm95_vm6 = vcmp.eq.s32.totalorder %v265_v2, 1 }
   0x6   :  { %48 = vadd.xlane.f32.xlu0 %v47_v4  ;;  %v52_v6 = vsel %vm51_vm3, %v32_v1, 0.0  ;;  %v82_v11 = vsel %vm77_vm5, %v81_v10, 0.0  ;;  %vm105_vm7 = vcmp.eq.s32.totalorder %v265_v2, 2  ;;  %vm115_vm8 = vcmp.eq.s32.totalorder %v265_v2, 3 }
   0x7   :  { %vm125_vm9 = vcmp.eq.s32.totalorder %v265_v2, 4  ;;  %v60_v31 = vadd.s32 8, %v43_v3  ;;  %vm135_vm11 = vcmp.eq.s32.totalorder %v265_v2, 5  ;;  %vm145_vm14 = vcmp.eq.s32.totalorder %v265_v2, 6 }
   0x8   :  { %vm155_vm0 = vcmp.eq.s32.totalorder %v265_v2, 7  ;;  %vm179_vm2 = vcmp.eq.s32.totalorder %v265_v2, 9 }
   0x9   :  { %vm61_vm10 = vcmp.eq.s32.totalorder %v60_v31, %v265_v2  ;;  %vm66_vm12 = vcmp.ge.s32.totalorder %v60_v31, %v265_v2  ;;  %vm88_vm15 = vcmp.eq.s32.totalorder %v265_v2, %v60_v31 }
   0xa   :  { %v63_v37 = vsel %vm61_vm10, %v34_v36, 0.0  ;;  %vm67_vm13 = vmand %vm66_vm12, %vm41_vm1  ;;  %v89_v54 = vsel %vm88_vm15, -1.0, %v251_v53  ;;  %vm165_vm1 = vcmp.eq.s32.totalorder %v265_v2, 8 }
   0xb   :  { %v68_v44 = vsel %vm67_vm13, %v34_v36, 0.0 }
  0x8f   :  { %v268_v5 = vpop.xlane.xlu0 %48 }
  0x90   :  { %246 = vrcp.f32 %v268_v5  ;;  %vm190_vm4 = vweird.f32 %v268_v5 }
  0x9d   :  { %v275_v7 = vpop.eup %246 }
  0x9e   :  { %v54_v8 = vmul.f32 %v275_v7, %v52_v6 }
  0xa0   :  { %55 = vst [vmem:[#allocation2] sm:$0xff] %v54_v8 }
  0xa7   :  { %v91_v12 = vld [vmem:[#allocation2 + $0x1] ss:$0 sm:$0xff]  ;;  %v101_v15 = vld [vmem:[#allocation2 + $0x2] ss:$0 sm:$0xff]  ;;  %v111_v20 = vld [vmem:[#allocation2 + $0x3] ss:$0 sm:$0xff] }
  0xa8   :  { %v92_v13 = vxor.u32 2147483648, %v91_v12  ;;  %v102_v17 = vxor.u32 2147483648, %v101_v15  ;;  %v112_v22 = vxor.u32 2147483648, %v111_v20  ;;  %v121_v25 = vld [vmem:[#allocation2 + $0x4] ss:$0 sm:$0xff] }
  0xa9   :  { %v122_v27 = vxor.u32 2147483648, %v121_v25  ;;  %v131_v30 = vld [vmem:[#allocation2 + $0x5] ss:$0 sm:$0xff]  ;;  %v141_v38 = vld [vmem:[#allocation2 + $0x6] ss:$0 sm:$0xff] }
  0xaa   :  { %v96_v14 = vmul.f32 %v92_v13, %v82_v11  ;;  %v132_v33 = vxor.u32 2147483648, %v131_v30  ;;  %v142_v40 = vxor.u32 2147483648, %v141_v38  ;;  %v151_v47 = vld [vmem:[#allocation2 + $0x7] ss:$0 sm:$0xff] }
  0xab   :  { %v152_v50 = vxor.u32 2147483648, %v151_v47 }
  0xac   :  { %97 = vadd.xlane.f32.xlu0 %v96_v14 }
 0x135   :  { %v98_v16 = vpop.xlane.xlu0 %97 }
 0x136   :  { %v99_v18 = vsel %vm95_vm6, %v98_v16, %v82_v11 }
 0x137   :  { %v106_v19 = vmul.f32 %v102_v17, %v99_v18 }
 0x139   :  { %107 = vadd.xlane.f32.xlu1 %v106_v19 }
 0x1c2   :  { %v108_v21 = vpop.xlane.xlu1 %107 }
 0x1c3   :  { %v109_v23 = vsel %vm105_vm7, %v108_v21, %v99_v18 }
 0x1c4   :  { %v116_v24 = vmul.f32 %v112_v22, %v109_v23 }
 0x1c6   :  { %117 = vadd.xlane.f32.xlu1 %v116_v24 }
 0x24f   :  { %v118_v26 = vpop.xlane.xlu1 %117 }
 0x250   :  { %v119_v28 = vsel %vm115_vm8, %v118_v26, %v109_v23 }
 0x251   :  { %v126_v29 = vmul.f32 %v122_v27, %v119_v28 }
 0x253   :  { %127 = vadd.xlane.f32.xlu0 %v126_v29 }
 0x2dc   :  { %v128_v32 = vpop.xlane.xlu0 %127 }
 0x2dd   :  { %v129_v34 = vsel %vm125_vm9, %v128_v32, %v119_v28 }
 0x2de   :  { %v136_v35 = vmul.f32 %v132_v33, %v129_v34 }
 0x2e0   :  { %137 = vadd.xlane.f32.xlu1 %v136_v35 }
 0x2e4   :  { %64 = vadd.xlane.f32.xlu1 %v63_v37 }
 0x369   :  { %v138_v39 = vpop.xlane.xlu1 %137 }
 0x36a   :  { %v139_v41 = vsel %vm135_vm11, %v138_v39, %v129_v34 }
 0x36b   :  { %v146_v42 = vmul.f32 %v142_v40, %v139_v41 }
 0x36d   :  { %147 = vadd.xlane.f32.xlu0 %v146_v42  ;;  %v65_v43 = vpop.xlane.xlu1 %64 }
 0x36e   :  { %248 = vrcp.f32 %v65_v43  ;;  %vm195_vm3 = vweird.f32 %v65_v43 }
 0x37b   :  { %v249_v45 = vpop.eup %248 }
 0x37c   :  { %v70_v46 = vmul.f32 %v249_v45, %v68_v44 }
 0x37e   :  { %71 = vst [vmem:[#allocation2 + $0x8] sm:$0xff] %v70_v46 }
 0x385   :  { %v161_v48 = vld [vmem:[#allocation2 + $0x8] ss:$0 sm:$0xff]  ;;  %v175_v59 = vld [vmem:[#allocation2 + $0x9] ss:$0 sm:$0xff] }
 0x386   :  { %v162_v51 = vxor.u32 2147483648, %v161_v48  ;;  %v176_v62 = vxor.u32 2147483648, %v175_v59 }
 0x388   :  { %v170_v56 = vmul.f32 %v162_v51, %v89_v54 }
 0x3f6   :  { %v148_v49 = vpop.xlane.xlu0 %147 }
 0x3f7   :  { %v149_v52 = vsel %vm145_vm14, %v148_v49, %v139_v41 }
 0x3f8   :  { %v156_v55 = vmul.f32 %v152_v50, %v149_v52 }
 0x3fa   :  { %157 = vadd.xlane.f32.xlu0 %v156_v55 }
 0x3fe   :  { %171 = vadd.xlane.f32.xlu0 %v170_v56 }
 0x483   :  { %v158_v57 = vpop.xlane.xlu0 %157 }
 0x484   :  { %v159_v58 = vsel %vm155_vm0, %v158_v57, %v149_v52 }
 0x485   :  { %v166_v60 = vmul.f32 %v162_v51, %v159_v58 }
 0x487   :  { %v172_v61 = vpop.xlane.xlu0 %171  ;;  %167 = vadd.xlane.f32.xlu1 %v166_v60 }
 0x488   :  { %v173_v63 = vsel %vm165_vm1, %v172_v61, %v89_v54 }
 0x489   :  { %v184_v0 = vmul.f32 %v176_v62, %v173_v63 }
 0x48b   :  { %185 = vadd.xlane.f32.xlu0 %v184_v0 }
 0x510   :  { %v168_v1 = vpop.xlane.xlu1 %167 }
 0x511   :  { %v169_v3 = vsel %vm165_vm1, %v168_v1, %v159_v58 }
 0x512   :  { %v180_v4 = vmul.f32 %v176_v62, %v169_v3 }
 0x514   :  { %v186_v6 = vpop.xlane.xlu0 %185  ;;  %181 = vadd.xlane.f32.xlu1 %v180_v4 }
 0x515   :  { %v187_v8 = vsel %vm179_vm2, %v186_v6, %v173_v63 }
 0x516   :  { %v194_v9 = vmul.f32 %v249_v45, %v187_v8 }
 0x518   :  { %v196_v10 = vsel %vm195_vm3, %v187_v8, %v194_v9 }
 0x519   :  { %232 = vst [vmem:[%s306_s1 + $0x8] sm:$0xff] %v196_v10 }
 0x59d   :  { %v182_v11 = vpop.xlane.xlu1 %181 }
 0x59e   :  { %v183_v12 = vsel %vm179_vm2, %v182_v11, %v169_v3 }
 0x59f   :  { %v189_v13 = vmul.f32 %v275_v7, %v183_v12 }
 0x5a1   :  { %v191_v14 = vsel %vm190_vm4, %v183_v12, %v189_v13 }
 0x5a2   :  { %230 = vst [vmem:[%s306_s1] sm:$0xff] %v191_v14 }

// kernel: custom-call.9
= control target key start
LH: loop header
LB: loop body
LE: loop exit
PB: predicated region body
PF: predicated region fallthrough
CT: control target
= control target key end

     0   :  { %v39_v0 = vlaneseq  ;;  %v273_v17 = vmov -1.0   ;;  %v274_v23 = vmov 0.0   ;;  %s338_s0 = inlined_call_operand.vmem [shape: f32[1,10,10], index: 0, kind: input, shape index: {}]   ;;  %s339_s1 = inlined_call_operand.vmem [shape: f32[1,10,10], index: 1, kind: output, shape index: {}]  }
   0x1   :  { %v34_v3 = vld [vmem:[%s338_s0 + $0x8] sm:$0xff]  ;;  %v32_v5 = vld [vmem:[%s338_s0] sm:$0xff] }
   0x2   :  { %v285_v1 = vand.u32 127, %v39_v0  ;;  %v43_v2 = vshrl.u32 %v39_v0, 7 }
   0x4   :  { %vm41_vm0 = vcmp.lt.s32.totalorder %v285_v1, 10  ;;  %v60_v4 = vadd.s32 8, %v43_v2  ;;  %vm50_vm1 = vcmp.le.s32.totalorder %v43_v2, %v285_v1  ;;  %vm45_vm5 = vcmp.eq.s32.totalorder %v43_v2, %v285_v1 }
   0x5   :  { %vm295_vm2 = vmand %vm50_vm1, %vm41_vm0  ;;  %v47_v10 = vsel %vm45_vm5, %v32_v5, 0.0  ;;  %vm87_vm7 = vcmp.eq.s32.totalorder %v285_v1, 9  ;;  %vm77_vm9 = vcmp.eq.s32.totalorder %v285_v1, %v43_v2  ;;  %vm95_vm10 = vcmp.eq.s32.totalorder %v285_v1, 8 }
   0x6   :  { %vm61_vm3 = vcmp.eq.s32.totalorder %v60_v4, %v285_v1  ;;  %vm66_vm4 = vcmp.le.s32.totalorder %v60_v4, %v285_v1  ;;  %v52_v7 = vsel %vm295_vm2, %v32_v5, 0.0  ;;  %vm84_vm8 = vcmp.eq.s32.totalorder %v285_v1, %v60_v4 }
   0x7   :  { %v63_v8 = vsel %vm61_vm3, %v34_v3, 0.0  ;;  %vm67_vm6 = vmand %vm66_vm4, %vm41_vm0  ;;  %v88_v18 = vsel %vm87_vm7, 1.0, %v273_v17  ;;  %v78_v24 = vsel %vm77_vm9, -1.0, %v274_v23  ;;  %vm105_vm11 = vcmp.eq.s32.totalorder %v285_v1, 7 }
   0x8   :  { %v68_v9 = vsel %vm67_vm6, %v34_v3, 0.0  ;;  %64 = vadd.xlane.f32.xlu0 %v63_v8  ;;  %v89_v19 = vsel %vm84_vm8, %v88_v18, 0.0  ;;  %vm119_vm12 = vcmp.eq.s32.totalorder %v285_v1, 6  ;;  %vm133_vm13 = vcmp.eq.s32.totalorder %v285_v1, 5 }
   0x9   :  { %vm147_vm14 = vcmp.eq.s32.totalorder %v285_v1, 4  ;;  %vm161_vm15 = vcmp.eq.s32.totalorder %v285_v1, 3  ;;  %vm175_vm0 = vcmp.eq.s32.totalorder %v285_v1, 2  ;;  %vm189_vm1 = vcmp.eq.s32.totalorder %v285_v1, 1 }
   0xa   :  { %vm202_vm2 = vcmp.eq.s32.totalorder %v285_v1, 0 }
   0xc   :  { %48 = vadd.xlane.f32.xlu0 %v47_v10 }
  0x91   :  { %v304_v11 = vpop.xlane.xlu0 %64 }
  0x92   :  { %269 = vrcp.f32 %v304_v11  ;;  %vm218_vm4 = vweird.f32 %v304_v11 }
  0x95   :  { %v307_v12 = vpop.xlane.xlu0 %48 }
  0x96   :  { %271 = vrcp.f32 %v307_v12  ;;  %vm213_vm3 = vweird.f32 %v307_v12 }
  0x9f   :  { %v310_v13 = vpop.eup %269 }
  0xa0   :  { %v70_v14 = vmul.f32 %v310_v13, %v68_v9 }
  0xa2   :  { %71 = vst [vmem:[#allocation2 + $0x8] sm:$0xff] %v70_v14 }
  0xa3   :  { %v313_v15 = vpop.eup %271 }
  0xa4   :  { %v54_v16 = vmul.f32 %v313_v15, %v52_v7 }
  0xa6   :  { %55 = vst [vmem:[#allocation2] sm:$0xff] %v54_v16 }
  0xa9   :  { %v91_v20 = vld [vmem:[#allocation2 + $0x8] ss:$0 sm:$0xff] }
  0xaa   :  { %v92_v21 = vxor.u32 2147483648, %v91_v20 }
  0xac   :  { %v96_v22 = vmul.f32 %v92_v21, %v89_v19 }
  0xad   :  { %v101_v25 = vld [vmem:[#allocation2 + $0x7] ss:$0 sm:$0xff]  ;;  %v115_v30 = vld [vmem:[#allocation2 + $0x6] ss:$0 sm:$0xff]  ;;  %v129_v38 = vld [vmem:[#allocation2 + $0x5] ss:$0 sm:$0xff] }
  0xae   :  { %97 = vadd.xlane.f32.xlu1 %v96_v22  ;;  %v102_v26 = vxor.u32 2147483648, %v101_v25  ;;  %v116_v33 = vxor.u32 2147483648, %v115_v30  ;;  %v130_v41 = vxor.u32 2147483648, %v129_v38  ;;  %v143_v46 = vld [vmem:[#allocation2 + $0x4] ss:$0 sm:$0xff] }
  0xaf   :  { %v144_v49 = vxor.u32 2147483648, %v143_v46  ;;  %v157_v54 = vld [vmem:[#allocation2 + $0x3] ss:$0 sm:$0xff]  ;;  %v171_v62 = vld [vmem:[#allocation2 + $0x2] ss:$0 sm:$0xff] }
  0xb0   :  { %v106_v27 = vmul.f32 %v102_v26, %v78_v24  ;;  %v158_v57 = vxor.u32 2147483648, %v157_v54  ;;  %v172_v2 = vxor.u32 2147483648, %v171_v62  ;;  %v185_v7 = vld [vmem:[#allocation2 + $0x1] ss:$0 sm:$0xff] }
  0xb1   :  { %v186_v10 = vxor.u32 2147483648, %v185_v7 }
  0xb2   :  { %107 = vadd.xlane.f32.xlu1 %v106_v27 }
 0x137   :  { %v98_v28 = vpop.xlane.xlu1 %97 }
 0x138   :  { %v99_v29 = vsel %vm95_vm10, %v98_v28, %v89_v19  ;;  %v198_v19 = vld [vmem:[#allocation2] ss:$0 sm:$0xff] }
 0x139   :  { %v110_v31 = vmul.f32 %v102_v26, %v99_v29  ;;  %v199_v22 = vxor.u32 2147483648, %v198_v19 }
 0x13b   :  { %111 = vadd.xlane.f32.xlu0 %v110_v31  ;;  %v108_v32 = vpop.xlane.xlu1 %107 }
 0x13c   :  { %v109_v34 = vsel %vm105_vm11, %v108_v32, %v78_v24 }
 0x13d   :  { %v120_v35 = vmul.f32 %v116_v33, %v109_v34 }
 0x13f   :  { %121 = vadd.xlane.f32.xlu1 %v120_v35 }
 0x1c4   :  { %v112_v36 = vpop.xlane.xlu0 %111 }
 0x1c5   :  { %v113_v37 = vsel %vm105_vm11, %v112_v36, %v99_v29 }
 0x1c6   :  { %v124_v39 = vmul.f32 %v116_v33, %v113_v37 }
 0x1c8   :  { %125 = vadd.xlane.f32.xlu0 %v124_v39  ;;  %v122_v40 = vpop.xlane.xlu1 %121 }
 0x1c9   :  { %v123_v42 = vsel %vm119_vm12, %v122_v40, %v109_v34 }
 0x1ca   :  { %v134_v43 = vmul.f32 %v130_v41, %v123_v42 }
 0x1cc   :  { %135 = vadd.xlane.f32.xlu1 %v134_v43 }
 0x251   :  { %v126_v44 = vpop.xlane.xlu0 %125 }
 0x252   :  { %v127_v45 = vsel %vm119_vm12, %v126_v44, %v113_v37 }
 0x253   :  { %v138_v47 = vmul.f32 %v130_v41, %v127_v45 }
 0x255   :  { %139 = vadd.xlane.f32.xlu0 %v138_v47  ;;  %v136_v48 = vpop.xlane.xlu1 %135 }
 0x256   :  { %v137_v50 = vsel %vm133_vm13, %v136_v48, %v123_v42 }
 0x257   :  { %v148_v51 = vmul.f32 %v144_v49, %v137_v50 }
 0x259   :  { %149 = vadd.xlane.f32.xlu1 %v148_v51 }
 0x2de   :  { %v140_v52 = vpop.xlane.xlu0 %139 }
 0x2df   :  { %v141_v53 = vsel %vm133_vm13, %v140_v52, %v127_v45 }
 0x2e0   :  { %v152_v55 = vmul.f32 %v144_v49, %v141_v53 }
 0x2e2   :  { %153 = vadd.xlane.f32.xlu0 %v152_v55  ;;  %v150_v56 = vpop.xlane.xlu1 %149 }
 0x2e3   :  { %v151_v58 = vsel %vm147_vm14, %v150_v56, %v137_v50 }
 0x2e4   :  { %v162_v59 = vmul.f32 %v158_v57, %v151_v58 }
 0x2e6   :  { %163 = vadd.xlane.f32.xlu1 %v162_v59 }
 0x36b   :  { %v154_v60 = vpop.xlane.xlu0 %153 }
 0x36c   :  { %v155_v61 = vsel %vm147_vm14, %v154_v60, %v141_v53 }
 0x36d   :  { %v166_v63 = vmul.f32 %v158_v57, %v155_v61 }
 0x36f   :  { %167 = vadd.xlane.f32.xlu0 %v166_v63  ;;  %v164_v0 = vpop.xlane.xlu1 %163 }
 0x370   :  { %v165_v3 = vsel %vm161_vm15, %v164_v0, %v151_v58 }
 0x371   :  { %v176_v4 = vmul.f32 %v172_v2, %v165_v3 }
 0x373   :  { %177 = vadd.xlane.f32.xlu1 %v176_v4 }
 0x3f8   :  { %v168_v5 = vpop.xlane.xlu0 %167 }
 0x3f9   :  { %v169_v6 = vsel %vm161_vm15, %v168_v5, %v155_v61 }
 0x3fa   :  { %v180_v8 = vmul.f32 %v172_v2, %v169_v6 }
 0x3fc   :  { %181 = vadd.xlane.f32.xlu0 %v180_v8  ;;  %v178_v9 = vpop.xlane.xlu1 %177 }
 0x3fd   :  { %v179_v14 = vsel %vm175_vm0, %v178_v9, %v165_v3 }
 0x3fe   :  { %v190_v16 = vmul.f32 %v186_v10, %v179_v14 }
 0x400   :  { %191 = vadd.xlane.f32.xlu1 %v190_v16 }
 0x485   :  { %v182_v17 = vpop.xlane.xlu0 %181 }
 0x486   :  { %v183_v18 = vsel %vm175_vm0, %v182_v17, %v169_v6 }
 0x487   :  { %v194_v20 = vmul.f32 %v186_v10, %v183_v18 }
 0x489   :  { %195 = vadd.xlane.f32.xlu0 %v194_v20  ;;  %v192_v21 = vpop.xlane.xlu1 %191 }
 0x48a   :  { %v193_v23 = vsel %vm189_vm1, %v192_v21, %v179_v14 }
 0x48b   :  { %v203_v24 = vmul.f32 %v199_v22, %v193_v23 }
 0x48d   :  { %204 = vadd.xlane.f32.xlu1 %v203_v24 }
 0x512   :  { %v196_v25 = vpop.xlane.xlu0 %195 }
 0x513   :  { %v197_v26 = vsel %vm189_vm1, %v196_v25, %v183_v18 }
 0x514   :  { %v207_v27 = vmul.f32 %v199_v22, %v197_v26 }
 0x516   :  { %208 = vadd.xlane.f32.xlu0 %v207_v27  ;;  %v205_v28 = vpop.xlane.xlu1 %204 }
 0x517   :  { %v206_v29 = vsel %vm202_vm2, %v205_v28, %v193_v23 }
 0x518   :  { %v212_v30 = vmul.f32 %v313_v15, %v206_v29 }
 0x51a   :  { %v214_v31 = vsel %vm213_vm3, %v206_v29, %v212_v30 }
 0x51b   :  { %253 = vst [vmem:[%s339_s1] sm:$0xff] %v214_v31 }
 0x59f   :  { %v209_v32 = vpop.xlane.xlu0 %208 }
 0x5a0   :  { %v210_v33 = vsel %vm202_vm2, %v209_v32, %v197_v26 }
 0x5a1   :  { %v217_v34 = vmul.f32 %v310_v13, %v210_v33 }
 0x5a3   :  { %v219_v35 = vsel %vm218_vm4, %v210_v33, %v217_v34 }
 0x5a4   :  { %255 = vst [vmem:[%s339_s1 + $0x8] sm:$0xff] %v219_v35 }

// kernel: rrnet_forward.1
= control target key start
LH: loop header
LB: loop body
LE: loop exit
PB: predicated region body
PF: predicated region fallthrough
CT: control target
= control target key end

     0   :  { %vm1068_vm1 = vcmask 203776   ;;  %vm1072_vm2 = vcmask 196608   ;;  %s1720_s1 = inlined_call_operand.vmem [shape: bf16[1024,128], index: 1, kind: input, shape index: {}]   ;;  %s1721_s0 = inlined_call_operand.vmem [shape: bf16[25,1024], index: 0, kind: input, shape index: {}]   ;;  %s1722_s3 = inlined_call_operand.vmem [shape: bf16[128,128], index: 3, kind: input, shape index: {}]   ;;  %s1723_s2 = inlined_call_operand.vmem [shape: f32[1,128], index: 2, kind: input, shape index: {}]   ;;  %s1724_s4 = inlined_call_operand.vmem [shape: f32[1,128], index: 4, kind: input, shape index: {}]   ;;  %s1725_s5 = inlined_call_operand.vmem [shape: f32[25,25], index: 5, kind: output, shape index: {}]  }
   0x1   :  { %v1334_v0 = vld [vmem:[%s1720_s1 + $0x78] sm:$0xff]   ;;  %v1338_v4 = vld [vmem:[%s1720_s1 + $0x70] sm:$0xff]   ;;  %v1342_v8 = vld [vmem:[%s1720_s1 + $0x68] sm:$0xff]  }
   0x2   :  { %v1335_v1 = vld [vmem:[%s1720_s1 + $0xf8] sm:$0xff]   ;;  %1168 = vmatprep.subr.bf16.mxu0 %v1334_v0  ;;  %v1339_v5 = vld [vmem:[%s1720_s1 + $0xf0] sm:$0xff]   ;;  %v1343_v9 = vld [vmem:[%s1720_s1 + $0xe8] sm:$0xff]  }
   0x3   :  { %v1336_v2 = vld [vmem:[%s1720_s1 + $0x38] sm:$0xff]   ;;  %1196 = vmatprep.subr.bf16.mxu1 %v1335_v1  ;;  %v1340_v6 = vld [vmem:[%s1720_s1 + $0x30] sm:$0xff]   ;;  %v1344_v10 = vld [vmem:[%s1720_s1 + $0x28] sm:$0xff]  }
   0x4   :  { %v1337_v3 = vld [vmem:[%s1720_s1 + $0xb8] sm:$0xff]   ;;  %1169 = vmatpush3.bf16.msra.mxu0 %v1336_v2  ;;  %v1341_v7 = vld [vmem:[%s1720_s1 + $0xb0] sm:$0xff]   ;;  %v1345_v11 = vld [vmem:[%s1720_s1 + $0xa8] sm:$0xff]  }
   0x5   :  { %1197 = vmatpush3.bf16.msra.mxu1 %v1337_v3  ;;  %1170 = vmatprep.subr.bf16.mxu0 %v1338_v4  ;;  %v1346_v12 = vld [vmem:[%s1720_s1 + $0x60] sm:$0xff]   ;;  %v1350_v16 = vld [vmem:[%s1720_s1 + $0x58] sm:$0xff]   ;;  %v1354_v20 = vld [vmem:[%s1720_s1 + $0x50] sm:$0xff]  }
   0x6   :  { %1198 = vmatprep.subr.bf16.mxu1 %v1339_v5  ;;  %v1347_v13 = vld [vmem:[%s1720_s1 + $0xe0] sm:$0xff]   ;;  %v1351_v17 = vld [vmem:[%s1720_s1 + $0xd8] sm:$0xff]   ;;  %v1355_v21 = vld [vmem:[%s1720_s1 + $0xd0] sm:$0xff]  }
   0x7   :  { %v1348_v14 = vld [vmem:[%s1720_s1 + $0x20] sm:$0xff]   ;;  %v1352_v18 = vld [vmem:[%s1720_s1 + $0x18] sm:$0xff]   ;;  %v1356_v22 = vld [vmem:[%s1720_s1 + $0x10] sm:$0xff]  }
   0x8   :  { %1171 = vmatpush3.bf16.msra.mxu0 %v1340_v6  ;;  %v1349_v15 = vld [vmem:[%s1720_s1 + $0xa0] sm:$0xff]   ;;  %v1353_v19 = vld [vmem:[%s1720_s1 + $0x98] sm:$0xff]   ;;  %v1357_v23 = vld [vmem:[%s1720_s1 + $0x90] sm:$0xff]  }
   0x9   :  { %1199 = vmatpush3.bf16.msra.mxu1 %v1341_v7  ;;  %1172 = vmatprep.subr.bf16.mxu0 %v1342_v8  ;;  %v1358_v24 = vld [vmem:[%s1720_s1 + $0x48] sm:$0xff]   ;;  %v1362_v28 = vld [vmem:[%s1720_s1 + $0x40] sm:$0xff]   ;;  %v1366_v40 = vld [vmem:[%s1720_s1 + $0x178] sm:$0xff]  }
   0xa   :  { %1200 = vmatprep.subr.bf16.mxu1 %v1343_v9  ;;  %v1359_v25 = vld [vmem:[%s1720_s1 + $0xc8] sm:$0xff]   ;;  %v1363_v29 = vld [vmem:[%s1720_s1 + $0xc0] sm:$0xff]   ;;  %v1367_v41 = vld [vmem:[%s1720_s1 + $0x1f8] sm:$0xff]  }
   0xb   :  { %v1360_v26 = vld [vmem:[%s1720_s1 + $0x8] sm:$0xff]   ;;  %v1364_v30 = vld [vmem:[%s1720_s1] sm:$0xff]   ;;  %v1368_v42 = vld [vmem:[%s1720_s1 + $0x138] sm:$0xff]  }
   0xc   :  { %1173 = vmatpush3.bf16.msra.mxu0 %v1344_v10  ;;  %v1361_v27 = vld [vmem:[%s1720_s1 + $0x88] sm:$0xff]   ;;  %v1365_v31 = vld [vmem:[%s1720_s1 + $0x80] sm:$0xff]   ;;  %v1369_v43 = vld [vmem:[%s1720_s1 + $0x1b8] sm:$0xff]  }
   0xd   :  { %1201 = vmatpush3.bf16.msra.mxu1 %v1345_v11  ;;  %1174 = vmatprep.subr.bf16.mxu0 %v1346_v12  ;;  %v21_v32 = vld [vmem:[%s1721_s0] sm:$0xff]  ;;  %v22_v34 = vld [vmem:[%s1721_s0 + $0x8] sm:$0xff]  ;;  %v1370_v44 = vld [vmem:[%s1720_s1 + $0x170] sm:$0xff]  }
   0xe   :  { %1202 = vmatprep.subr.bf16.mxu1 %v1347_v13  ;;  %v25_v33 = vld [vmem:[%s1721_s0 + $0x20] sm:$0xff]  ;;  %v26_v37 = vld [vmem:[%s1721_s0 + $0x28] sm:$0xff]  ;;  %v1371_v45 = vld [vmem:[%s1720_s1 + $0x1f0] sm:$0xff]  }
   0xf   :  { %v1079_v35 = vcombine.low %v21_v32, %v25_v33  ;;  %v1080_v36 = vcombine.high %v21_v32, %v25_v33  ;;  %v1081_v38 = vcombine.low %v22_v34, %v26_v37  ;;  %v1082_v39 = vcombine.high %v22_v34, %v26_v37  ;;  %v1372_v46 = vld [vmem:[%s1720_s1 + $0x130] sm:$0xff]   ;;  %v1374_v48 = vld [vmem:[%s1720_s1 + $0x168] sm:$0xff]   ;;  %v1378_v52 = vld [vmem:[%s1720_s1 + $0x160] sm:$0xff]  }
  0x10   :  { %1175 = vmatpush3.bf16.msra.mxu0 %v1348_v14  ;;  %v1373_v47 = vld [vmem:[%s1720_s1 + $0x1b0] sm:$0xff]   ;;  %v1375_v49 = vld [vmem:[%s1720_s1 + $0x1e8] sm:$0xff]   ;;  %v1379_v53 = vld [vmem:[%s1720_s1 + $0x1e0] sm:$0xff]  }
  0x11   :  { %1203 = vmatpush3.bf16.msra.mxu1 %v1349_v15  ;;  %1176 = vmatprep.subr.bf16.mxu0 %v1350_v16  ;;  %v1376_v50 = vld [vmem:[%s1720_s1 + $0x128] sm:$0xff]   ;;  %v1380_v54 = vld [vmem:[%s1720_s1 + $0x120] sm:$0xff]   ;;  %v1382_v56 = vld [vmem:[%s1720_s1 + $0x158] sm:$0xff]  }
  0x12   :  { %1204 = vmatprep.subr.bf16.mxu1 %v1351_v17  ;;  %685 = vmatprep.mubr.bf16.mxu0 %v1080_v36  ;;  %v1377_v51 = vld [vmem:[%s1720_s1 + $0x1a8] sm:$0xff]   ;;  %v1381_v55 = vld [vmem:[%s1720_s1 + $0x1a0] sm:$0xff]   ;;  %v1383_v57 = vld [vmem:[%s1720_s1 + $0x1d8] sm:$0xff]  }
  0x13   :  { %734 = vmatprep.mubr.bf16.mxu1 %v1082_v39  ;;  %v29_v58 = vld [vmem:[%s1721_s0 + $0x40] sm:$0xff]  ;;  %v1384_v61 = vld [vmem:[%s1720_s1 + $0x118] sm:$0xff]   ;;  %v30_v0 = vld [vmem:[%s1721_s0 + $0x48] sm:$0xff] }
  0x14   :  { %1177 = vmatpush3.bf16.msra.mxu0 %v1352_v18  ;;  %v33_v59 = vld [vmem:[%s1721_s0 + $0x60] sm:$0x11]  ;;  %v1385_v63 = vld [vmem:[%s1720_s1 + $0x198] sm:$0xff]   ;;  %v34_v1 = vld [vmem:[%s1721_s0 + $0x68] sm:$0x11] }
  0x15   :  { %1205 = vmatpush3.bf16.msra.mxu1 %v1353_v19  ;;  %1178 = vmatprep.subr.bf16.mxu0 %v1354_v20  ;;  %v1088_v60 = vcombine.high %v29_v58, %v33_v59  ;;  %v1087_v62 = vcombine.low %v29_v58, %v33_v59  ;;  %v1090_v2 = vcombine.high %v30_v0, %v34_v1  ;;  %v1386_v4 = vld [vmem:[%s1720_s1 + $0x150] sm:$0xff]   ;;  %v1390_v8 = vld [vmem:[%s1720_s1 + $0x148] sm:$0xff]   ;;  %v1394_v12 = vld [vmem:[%s1720_s1 + $0x140] sm:$0xff]  }
  0x16   :  { %1206 = vmatprep.subr.bf16.mxu1 %v1355_v21  ;;  %v1089_v3 = vcombine.low %v30_v0, %v34_v1  ;;  %v1387_v5 = vld [vmem:[%s1720_s1 + $0x1d0] sm:$0xff]   ;;  %v1391_v9 = vld [vmem:[%s1720_s1 + $0x1c8] sm:$0xff]   ;;  %v1395_v13 = vld [vmem:[%s1720_s1 + $0x1c0] sm:$0xff]  }
  0x17   :  { %v1388_v6 = vld [vmem:[%s1720_s1 + $0x110] sm:$0xff]   ;;  %v1392_v10 = vld [vmem:[%s1720_s1 + $0x108] sm:$0xff]   ;;  %v1396_v14 = vld [vmem:[%s1720_s1 + $0x100] sm:$0xff]  }
  0x18   :  { %1179 = vmatpush3.bf16.msra.mxu0 %v1356_v22  ;;  %v1389_v7 = vld [vmem:[%s1720_s1 + $0x190] sm:$0xff]   ;;  %v1393_v11 = vld [vmem:[%s1720_s1 + $0x188] sm:$0xff]   ;;  %v1397_v15 = vld [vmem:[%s1720_s1 + $0x180] sm:$0xff]  }
  0x19   :  { %1207 = vmatpush3.bf16.msra.mxu1 %v1357_v23  ;;  %1180 = vmatprep.subr.bf16.mxu0 %v1358_v24  ;;  %v23_v16 = vld [vmem:[%s1721_s0 + $0x10] sm:$0xff]  ;;  %v24_v18 = vld [vmem:[%s1721_s0 + $0x18] sm:$0xff]  ;;  %v1400_v34 = vld [vmem:[%s1722_s3 + $0x28] sm:$0xff]  }
  0x1a   :  { %1208 = vmatprep.subr.bf16.mxu1 %v1359_v25  ;;  %v27_v17 = vld [vmem:[%s1721_s0 + $0x30] sm:$0xff]  ;;  %v28_v19 = vld [vmem:[%s1721_s0 + $0x38] sm:$0xff]  ;;  %v1405_v39 = vld [vmem:[%s1722_s3] sm:$0xff]  }
  0x1b   :  { %v1083_v20 = vcombine.low %v23_v16, %v27_v17  ;;  %v1084_v21 = vcombine.high %v23_v16, %v27_v17  ;;  %v1085_v22 = vcombine.low %v24_v18, %v28_v19  ;;  %v1086_v23 = vcombine.high %v24_v18, %v28_v19  ;;  %v31_v24 = vld [vmem:[%s1721_s0 + $0x50] sm:$0xff]  ;;  %v1398_v32 = vld [vmem:[%s1722_s3 + $0x38] sm:$0xff]  }
  0x1c   :  { %1181 = vmatpush3.bf16.msra.mxu0 %v1360_v26  ;;  %v35_v25 = vld [vmem:[%s1721_s0 + $0x70] sm:$0x11]  ;;  %v32_v26 = vld [vmem:[%s1721_s0 + $0x58] sm:$0xff] }
  0x1d   :  { %1209 = vmatpush3.bf16.msra.mxu1 %v1361_v27  ;;  %1182 = vmatprep.subr.bf16.mxu0 %v1362_v28  ;;  %v1092_v27 = vcombine.high %v31_v24, %v35_v25  ;;  %v36_v28 = vld [vmem:[%s1721_s0 + $0x78] sm:$0x11]  ;;  %v1399_v33 = vld [vmem:[%s1722_s3 + $0x30] sm:$0xff]  }
  0x1e   :  { %1210 = vmatprep.subr.bf16.mxu1 %v1363_v29  ;;  %v1094_v29 = vcombine.high %v32_v26, %v36_v28  ;;  %v1402_v36 = vld [vmem:[%s1722_s3 + $0x18] sm:$0xff]   ;;  %v1403_v37 = vld [vmem:[%s1722_s3 + $0x10] sm:$0xff]  }
  0x20   :  { %1183 = vmatpush3.bf16.msra.mxu0 %v1364_v30  ;;  %v1091_v30 = vcombine.low %v31_v24, %v35_v25 }
  0x21   :  { %1211 = vmatpush3.bf16.msra.mxu1 %v1365_v31  ;;  %1224 = vmatprep.subr.bf16.mxu0 %v1366_v40  ;;  %v1093_v31 = vcombine.low %v32_v26, %v36_v28 }
  0x22   :  { %1252 = vmatprep.subr.bf16.mxu1 %v1367_v41 }
  0x23   :  { %686 = vmatmul.mubr.bf16.vlgmr.msra.gmra.mxu0 %v1079_v35  ;;  %v1401_v35 = vld [vmem:[%s1722_s3 + $0x20] sm:$0xff]  }
  0x24   :  { %735 = vmatmul.mubr.bf16.vlgmr.msra.gmra.mxu1 %v1081_v38  ;;  %1225 = vmatpush3.bf16.msra.mxu0 %v1368_v42  ;;  %v1404_v38 = vld [vmem:[%s1722_s3 + $0x8] sm:$0xff]  }
  0x25   :  { %1253 = vmatpush3.bf16.msra.mxu1 %v1369_v43  ;;  %1226 = vmatprep.subr.bf16.mxu0 %v1370_v44 }
  0x26   :  { %1254 = vmatprep.subr.bf16.mxu1 %v1371_v45  ;;  %693 = vmatprep.mubr.bf16.mxu0 %v1088_v60 }
  0x27   :  { %742 = vmatprep.mubr.bf16.mxu1 %v1090_v2 }
  0x28   :  { %1227 = vmatpush3.bf16.msra.mxu0 %v1372_v46 }
  0x29   :  { %1255 = vmatpush3.bf16.msra.mxu1 %v1373_v47  ;;  %1228 = vmatprep.subr.bf16.mxu0 %v1374_v48 }
  0x2a   :  { %1256 = vmatprep.subr.bf16.mxu1 %v1375_v49 }
  0x2b   :  { %694 = vmatmul.mubr.bf16.gmra.mxu0 %v1087_v62 }
  0x2c   :  { %1229 = vmatpush3.bf16.msra.mxu0 %v1376_v50  ;;  %743 = vmatmul.mubr.bf16.gmra.mxu1 %v1089_v3 }
  0x2d   :  { %1257 = vmatpush3.bf16.msra.mxu1 %v1377_v51  ;;  %1230 = vmatprep.subr.bf16.mxu0 %v1378_v52 }
  0x2e   :  { %1258 = vmatprep.subr.bf16.mxu1 %v1379_v53  ;;  %783 = vmatprep.mubr.bf16.mxu0 %v1084_v21 }
  0x2f   :  { %832 = vmatprep.mubr.bf16.mxu1 %v1086_v23 }
  0x30   :  { %1231 = vmatpush3.bf16.msra.mxu0 %v1380_v54 }
  0x31   :  { %1259 = vmatpush3.bf16.msra.mxu1 %v1381_v55  ;;  %1232 = vmatprep.subr.bf16.mxu0 %v1382_v56  ;;  %v1078_v55 = vld [vmem:[%s1723_s2] ss:$0 sm:$0xff] }
  0x32   :  { %1260 = vmatprep.subr.bf16.mxu1 %v1383_v57 }
  0x34   :  { %1233 = vmatpush3.bf16.msra.mxu0 %v1384_v61 }
  0x35   :  { %1261 = vmatpush3.bf16.msra.mxu1 %v1385_v63  ;;  %1234 = vmatprep.subr.bf16.mxu0 %v1386_v4 }
  0x36   :  { %1262 = vmatprep.subr.bf16.mxu1 %v1387_v5 }
  0x38   :  { %1235 = vmatpush3.bf16.msra.mxu0 %v1388_v6 }
  0x39   :  { %1263 = vmatpush3.bf16.msra.mxu1 %v1389_v7  ;;  %1236 = vmatprep.subr.bf16.mxu0 %v1390_v8 }
  0x3a   :  { %1264 = vmatprep.subr.bf16.mxu1 %v1391_v9 }
  0x3c   :  { %1237 = vmatpush3.bf16.msra.mxu0 %v1392_v10 }
  0x3d   :  { %1265 = vmatpush3.bf16.msra.mxu1 %v1393_v11  ;;  %1238 = vmatprep.subr.bf16.mxu0 %v1394_v12 }
  0x3e   :  { %1266 = vmatprep.subr.bf16.mxu1 %v1395_v13 }
  0x40   :  { %1239 = vmatpush3.bf16.msra.mxu0 %v1396_v14 }
  0x41   :  { %1267 = vmatpush3.bf16.msra.mxu1 %v1397_v15  ;;  %1298 = vmatprep.subr.bf16.mxu0 %v1398_v32 }
  0x43   :  { %784 = vmatmul.mubr.bf16.vlgmr.msra.gmra.mxu0 %v1083_v20 }
  0x44   :  { %833 = vmatmul.mubr.bf16.vlgmr.msra.gmra.mxu1 %v1085_v22  ;;  %791 = vmatprep.mubr.bf16.mxu0 %v1092_v27 }
  0x45   :  { %840 = vmatprep.mubr.bf16.mxu1 %v1094_v29  ;;  %1299 = vmatpush3.bf16.msra.mxu0 %v1398_v32 }
  0x46   :  { %1300 = vmatprep.subr.bf16.mxu0 %v1399_v33 }
  0x49   :  { %1301 = vmatpush3.bf16.msra.mxu0 %v1399_v33 }
  0x4a   :  { %1302 = vmatprep.subr.bf16.mxu0 %v1400_v34 }
  0x4b   :  { %792 = vmatmul.mubr.bf16.gmra.mxu0 %v1091_v30 }
  0x4c   :  { %841 = vmatmul.mubr.bf16.gmra.mxu1 %v1093_v31 }
  0x4d   :  { %1303 = vmatpush3.bf16.msra.mxu0 %v1400_v34 }
  0x4e   :  { %1304 = vmatprep.subr.bf16.mxu0 %v1401_v35 }
  0x51   :  { %1305 = vmatpush3.bf16.msra.mxu0 %v1401_v35 }
  0x52   :  { %1306 = vmatprep.subr.bf16.mxu0 %v1402_v36 }
  0x55   :  { %1307 = vmatpush3.bf16.msra.mxu0 %v1402_v36 }
  0x56   :  { %1308 = vmatprep.subr.bf16.mxu0 %v1403_v37 }
  0x59   :  { %1309 = vmatpush3.bf16.msra.mxu0 %v1403_v37 }
  0x5a   :  { %1310 = vmatprep.subr.bf16.mxu0 %v1404_v38 }
  0x5d   :  { %1311 = vmatpush3.bf16.msra.mxu0 %v1404_v38 }
  0x5e   :  { %1312 = vmatprep.subr.bf16.mxu0 %v1405_v39 }
  0x61   :  { %1313 = vmatpush3.bf16.msra.mxu0 %v1405_v39 }
  0xe3   :  { %v1184_v40 = vpop.f32.mrf.mxu0 }
  0xe4   :  { %v1212_v41 = vpop.f32.mrf.mxu1 }
  0xe5   :  { %v1185_v42 = vpop.f32.mrf.mxu0 }
  0xe6   :  { %v1213_v43 = vpop.f32.mrf.mxu1  ;;  %v1186_v54 = vadd.f32 %v1185_v42, %v1184_v40 }
  0xe7   :  { %v1187_v44 = vpop.f32.mrf.mxu0  ;;  %v1214_v59 = vadd.f32 %v1213_v43, %v1212_v41 }
  0xe8   :  { %v1215_v45 = vpop.f32.mrf.mxu1  ;;  %v688_v58 = vadd.f32 %v1186_v54, %v1078_v55 }
  0xe9   :  { %v1188_v46 = vpop.f32.mrf.mxu0 }
  0xea   :  { %v1216_v47 = vpop.f32.mrf.mxu1  ;;  %v1189_v60 = vadd.f32 %v1188_v46, %v1187_v44  ;;  %v737_v2 = vadd.f32 %v1214_v59, %v688_v58 }
  0xeb   :  { %v1190_v48 = vpop.f32.mrf.mxu0  ;;  %v1217_v7 = vadd.f32 %v1216_v47, %v1215_v45  ;;  %v958_v47 = vlaneseq }
  0xec   :  { %v1218_v49 = vpop.f32.mrf.mxu1  ;;  %v691_v3 = vadd.f32 %v1189_v60, %v1078_v55 }
  0xed   :  { %v1191_v50 = vpop.f32.mrf.mxu0 }
  0xee   :  { %v1219_v51 = vpop.f32.mrf.mxu1  ;;  %v1192_v63 = vadd.f32 %v1191_v50, %v1190_v48  ;;  %v740_v13 = vadd.f32 %v1217_v7, %v691_v3  ;;  %v959_v48 = vshrl.u32 %v958_v47, 7  ;;  %v1159_v50 = vld [vmem:[%s1724_s4] ss:$0 sm:$0xff] }
  0xef   :  { %v1193_v52 = vpop.f32.mrf.mxu0  ;;  %v1220_v10 = vadd.f32 %v1219_v51, %v1218_v49 }
  0xf0   :  { %v1221_v53 = vpop.f32.mrf.mxu1  ;;  %v696_v9 = vadd.f32 %v1192_v63, %v1078_v55 }
  0xf1   :  { %v1194_v56 = vpop.f32.mrf.mxu0 }
  0xf2   :  { %v1222_v57 = vpop.f32.mrf.mxu1  ;;  %v1195_v14 = vadd.f32 %v1194_v56, %v1193_v52  ;;  %v745_v22 = vadd.f32 %v1220_v10, %v696_v9 }
  0xf3   :  { %v1223_v26 = vadd.f32 %v1222_v57, %v1221_v53  ;;  %v960_v53 = vadd.s32 8, %v959_v48 }
  0xf4   :  { %v699_v25 = vadd.f32 %v1195_v14, %v1078_v55 }
  0xf5   :  { %vm964_vm0 = vcmp.lt.s32.totalorder %v960_v53, 10 }
  0xf6   :  { %v748_v36 = vadd.f32 %v1223_v26, %v699_v25 }
 0x103   :  { %v1240_v61 = vpop.f32.mrf.mxu0 }
 0x104   :  { %v1268_v62 = vpop.f32.mrf.mxu1 }
 0x105   :  { %v1241_v0 = vpop.f32.mrf.mxu0 }
 0x106   :  { %v1269_v1 = vpop.f32.mrf.mxu1  ;;  %v1242_v4 = vadd.f32 %v1241_v0, %v1240_v61 }
 0x107   :  { %v1243_v5 = vpop.f32.mrf.mxu0  ;;  %v1270_v15 = vadd.f32 %v1269_v1, %v1268_v62  ;;  %v1406_v62 = vmov 0.0   ;;  %v1407_v1 = vmov 1.0  }
 0x108   :  { %v1271_v6 = vpop.f32.mrf.mxu1  ;;  %v786_v8 = vadd.f32 %v1242_v4, %v737_v2  ;;  %v976_v63 = vsel %vm964_vm0, 0.31622776, %v1406_v62  ;;  %v968_v2 = vsel %vm964_vm0, 0.31622776, %v1407_v1 }
 0x109   :  { %v1244_v11 = vpop.f32.mrf.mxu0 }
 0x10a   :  { %v1272_v12 = vpop.f32.mrf.mxu1  ;;  %v1245_v16 = vadd.f32 %v1244_v11, %v1243_v5  ;;  %v835_v19 = vadd.f32 %v1270_v15, %v786_v8 }
 0x10b   :  { %v1246_v17 = vpop.f32.mrf.mxu0  ;;  %v1273_v21 = vadd.f32 %v1272_v12, %v1271_v6 }
 0x10c   :  { %v1274_v18 = vpop.f32.mrf.mxu1  ;;  %v789_v20 = vadd.f32 %v1245_v16, %v740_v13  ;;  %v849_v31 = vmax.f32 %v835_v19, 0.0 }
 0x10d   :  { %v1247_v23 = vpop.f32.mrf.mxu0 }
 0x10e   :  { %v1275_v24 = vpop.f32.mrf.mxu1  ;;  %v838_v27 = vadd.f32 %v1273_v21, %v789_v20  ;;  %v1248_v28 = vadd.f32 %v1247_v23, %v1246_v17 }
 0x10f   :  { %v1249_v29 = vpop.f32.mrf.mxu0  ;;  %v1276_v37 = vadd.f32 %v1275_v24, %v1274_v18 }
 0x110   :  { %v1277_v30 = vpop.f32.mrf.mxu1  ;;  %v850_v32 = vmax.f32 %v838_v27, 0.0  ;;  %v794_v33 = vadd.f32 %v1248_v28, %v745_v22 }
 0x111   :  { %v1250_v34 = vpop.f32.mrf.mxu0 }
 0x112   :  { %v1278_v35 = vpop.f32.mrf.mxu1  ;;  %v1251_v38 = vadd.f32 %v1250_v34, %v1249_v29  ;;  %v853_v39 = vpack.c.bf16 %v850_v32, %v849_v31  ;;  %v843_v40 = vadd.f32 %v1276_v37, %v794_v33 }
 0x113   :  { %v1279_v42 = vadd.f32 %v1278_v35, %v1277_v30 }
 0x114   :  { %v797_v41 = vadd.f32 %v1251_v38, %v748_v36  ;;  %1314 = vmatprep.mubr.bf16.mxu0 %v853_v39  ;;  %v851_v44 = vmax.f32 %v843_v40, 0.0 }
 0x116   :  { %v846_v43 = vadd.f32 %v1279_v42, %v797_v41 }
 0x118   :  { %v852_v45 = vmax.f32 %v846_v43, 0.0 }
 0x11a   :  { %v854_v46 = vpack.c.bf16 %v852_v45, %v851_v44 }
 0x11c   :  { %1315 = vmatmul.mubr.bf16.vlgmr.msra.gmra.mxu0 %v854_v46 }
 0x1dc   :  { %v1316_v49 = vpop.f32.mrf.mxu0 }
 0x1dd   :  { %v952_v55 = vadd.f32 %v1316_v49, %v1159_v50 }
 0x1de   :  { %v943_v51 = vpop.f32.mrf.mxu0 }
 0x1df   :  { %v944_v52 = vadd.f32 %v1159_v50, %v943_v51  ;;  %v981_v60 = vmul.f32 0.0, %v952_v55 }
 0x1e0   :  { %v1317_v54 = vpop.f32.mrf.mxu0 }
 0x1e1   :  { %v971_v56 = vmul.f32 0.31622776, %v944_v52  ;;  %v955_v57 = vadd.f32 %v1317_v54, %v1159_v50 }
 0x1e2   :  { %v946_v58 = vpop.f32.mrf.mxu0 }
 0x1e3   :  { %v982_v59 = vmul.f32 0.0, %v955_v57  ;;  %1326 = vmatprep.mubr.f32.mxu1 %v971_v56  ;;  %v947_v61 = vadd.f32 %v1159_v50, %v946_v58 }
 0x1e5   :  { %1318 = vmatprep.subr.mxu1 %v982_v59  ;;  %v980_v0 = vmul.f32 %v976_v63, %v947_v61  ;;  %v972_v3 = vmul.f32 %v968_v2, %v947_v61 }
 0x1e6   :  { %1319 = vmatpush3.xpose.msra.mxu1 %v982_v59 }
 0x1e7   :  { %1320 = vmatprep.subr.mxu1 %v981_v60 }
 0x1ea   :  { %1321 = vmatpush3.xpose.msra.mxu1 %v981_v60 }
 0x1eb   :  { %1322 = vmatprep.subr.mxu1 %v980_v0 }
 0x1ee   :  { %1323 = vmatpush3.xpose.msra.mxu1 %v980_v0 }
 0x1ef   :  { %1324 = vmatprep.subr.mxu1 %v971_v56 }
 0x1f2   :  { %1325 = vmatpush3.xpose.msra.mxu1 %v971_v56 }
 0x1f5   :  { %1327 = vmatmul.mubr.f32.vlgmr.msra.gmra.mxu1 %v972_v3 }
 0x1f6   :  { %1329 = vmatprep.mubr.f32.mxu1 %v952_v55 }
 0x1f9   :  { %1330 = vmatmul.mubr.f32.gmra.mxu1 %v955_v57 }
 0x2b5   :  { %v1328_v4 = vpop.f32.mrf.mxu1 }
 0x2b6   :  { %1070 = vst.msk [vmem:[%s1725_s5 + $0x8] sm:$0xff] %vm1068_vm1, %v1328_v4 }
 0x2b7   :  { %v1049_v5 = vpop.f32.mrf.mxu1 }
 0x2b8   :  { %1069 = vst.msk [vmem:[%s1725_s5] sm:$0xff] %vm1068_vm1, %v1049_v5 }
 0x2b9   :  { %v1331_v6 = vpop.f32.mrf.mxu1 }
 0x2ba   :  { %1073 = vst.msk [vmem:[%s1725_s5 + $0x18] sm:$0x1] %vm1072_vm2, %v1331_v6 }
 0x2bb   :  { %v1059_v7 = vpop.f32.mrf.mxu1 }
 0x2bc   :  { %1071 = vst.msk [vmem:[%s1725_s5 + $0x10] sm:$0xff] %vm1068_vm1, %v1059_v7 }

</bundles_post_ra>
